<compile_context>
chip_gen: v6e
topology: v6e:2x2x1
jax: 0.10.0
libtpu: 0.0.40
codegen_flags: <defaults>
</compile_context>

<pallas_src>
import functools

import jax
import jax.numpy as jnp
from jax.experimental import pallas as pl
from jax.experimental.pallas import tpu as pltpu


def _round_up(n, m):
    return ((n + m - 1) // m) * m


def bayesian_nn_kernel(x_ref, w1_ref, b1_ref, w2_ref, b2_ref, o_ref):
    # fc1: (tb, in) @ (in, hidden) on the MXU, f32 accumulation.
    x = x_ref[...].astype(jnp.bfloat16)
    h = jnp.dot(x, w1_ref[...], preferred_element_type=jnp.float32)
    # Bias add + ReLU in f32 (accumulator dtype; v5e VPU has no bf16).
    h = jnp.maximum(h + b1_ref[...], 0.0)
    # out: (tb, hidden) @ (hidden, out) on the MXU, f32 accumulation.
    y = jnp.dot(h.astype(jnp.bfloat16), w2_ref[...],
                preferred_element_type=jnp.float32)
    o_ref[...] = (y + b2_ref[...]).astype(o_ref.dtype)


def prepare_params(w1, b1, w2, b2):
    """One-time repack of PyTorch-layout Linear params (call once, reuse).

    w1: (hidden, in), b1: (hidden,), w2: (out, hidden), b2: (out,).
    Transposes weights to MXU-native (K, N) layout and casts them to bf16;
    biases become (1, N) f32 rows.  No padding of hidden / output dims.
    """
    w1t = jnp.asarray(w1, jnp.float32).T.astype(jnp.bfloat16)   # (in, hidden)
    b1r = jnp.asarray(b1, jnp.float32).reshape(1, -1)           # (1, hidden)
    w2t = jnp.asarray(w2, jnp.float32).T.astype(jnp.bfloat16)   # (hidden, out)
    b2r = jnp.asarray(b2, jnp.float32).reshape(1, -1)           # (1, out)
    return w1t, b1r, w2t, b2r


@functools.partial(jax.jit, static_argnames=("block_batch",))
def bayesian_nn_forward(x, w1t, b1, w2t, b2, *, block_batch=4096):
    """x: (B, input_size). Fold MC samples / micro-batches into B — the whole
    stack runs in ONE gridded pallas_call."""
    B, in_size = x.shape
    hidden = w1t.shape[1]
    out_size = w2t.shape[1]

    # Choose the number of grid steps first so batch padding stays < 8 rows
    # per step, then derive the tile.  Force >= 2 steps when there is enough
    # work so v7x's two TensorCores both get a share (no-op on v5e/v6e).
    steps = max(1, pl.cdiv(B, block_batch))
    if steps == 1 and B >= 16:
        steps = 2
    tb = _round_up(pl.cdiv(B, steps), 8)
    bp = steps * tb
    if bp != B:
        x = jnp.pad(x, ((0, bp - B), (0, 0)))

    # VMEM budget: double-buffered x/out tiles + resident bf16 weights +
    # f32 biases + the f32 hidden intermediate.
    vmem_bytes = (2 * tb * in_size * x.dtype.itemsize   # x tiles (dbl-buffered)
                  + 2 * tb * out_size * 4               # out tiles (dbl-buffered)
                  + in_size * hidden * 2                # W1 (bf16, resident)
                  + hidden * out_size * 2               # W2 (bf16, resident)
                  + (hidden + out_size) * 4             # biases (f32, resident)
                  + tb * hidden * 4)                    # h intermediate (f32)
    try:  # generation-aware cap with ~25% headroom
        vmem_cap = pltpu.get_tpu_info().vmem_capacity_bytes
    except Exception:
        vmem_cap = 64 << 20
    vmem_limit = int(min(max(2 * vmem_bytes, 16 << 20), (vmem_cap * 3) // 4))

    y = pl.pallas_call(
        bayesian_nn_kernel,
        out_shape=jax.ShapeDtypeStruct((bp, out_size), jnp.float32),
        grid=(steps,),
        in_specs=[
            pl.BlockSpec((tb, in_size), lambda i: (i, 0)),      # x streams
            pl.BlockSpec((in_size, hidden), lambda i: (0, 0)),  # W1 resident
            pl.BlockSpec((1, hidden), lambda i: (0, 0)),        # b1 resident
            pl.BlockSpec((hidden, out_size), lambda i: (0, 0)), # W2 resident
            pl.BlockSpec((1, out_size), lambda i: (0, 0)),      # b2 resident
        ],
        out_specs=pl.BlockSpec((tb, out_size), lambda i: (i, 0)),
        compiler_params=pltpu.CompilerParams(
            dimension_semantics=("parallel",),   # v7x: 2 TCs split the grid
            vmem_limit_bytes=vmem_limit),
    )(x, w1t, b1, w2t, b2)

    # Strip batch padding only when it was added (output has no lane padding).
    return y[:B] if bp != B else y


def init_linear_params(key, in_features, out_features):
    """Deterministic PyTorch-style init: U(-1/sqrt(fan_in), 1/sqrt(fan_in))."""
    kw, kb = jax.random.split(key)
    bound = 1.0 / jnp.sqrt(jnp.float32(in_features))
    w = jax.random.uniform(kw, (out_features, in_features), jnp.float32,
                           minval=-bound, maxval=bound)
    b = jax.random.uniform(kb, (out_features,), jnp.float32,
                           minval=-bound, maxval=bound)
    return w, b


def _ref_forward_quantized(x, w1, b1, w2, b2):
    """Pure-JAX reference with the same numerics as the kernel:
    bf16 weights/activations into the matmuls, f32 accumulation,
    f32 bias add + ReLU."""
    f32 = jnp.float32
    xb = x.astype(jnp.bfloat16).astype(f32)
    w1b = w1.astype(jnp.bfloat16).astype(f32)
    w2b = w2.astype(jnp.bfloat16).astype(f32)
    h = jnp.maximum(xb @ w1b.T + b1, 0.0)
    hb = h.astype(jnp.bfloat16).astype(f32)
    return hb @ w2b.T + b2


if __name__ == "__main__":
    # Small shapes consistent with the module: x is (batch, input_size).
    batch, input_size, hidden_size, output_size = 8, 32, 64, 16

    key = jax.random.PRNGKey(0)
    kx, k1, k2, kx2 = jax.random.split(key, 4)

    x = jax.random.normal(kx, (batch, input_size), jnp.float32)
    w1, b1 = init_linear_params(k1, input_size, hidden_size)   # fc1
    w2, b2 = init_linear_params(k2, hidden_size, output_size)  # out

    # One-time param repack (outside the hot loop).
    w1t, b1r, w2t, b2r = prepare_params(w1, b1, w2, b2)

    # --- small batch (grid = 1) ---
    y = bayesian_nn_forward(x, w1t, b1r, w2t, b2r)
    jax.block_until_ready(y)
    assert y.shape == (batch, output_size)

    y_ref_q = _ref_forward_quantized(x, w1, b1, w2, b2)
    y_ref_f = jnp.maximum(x @ w1.T + b1, 0.0) @ w2.T + b2
    assert jnp.allclose(y, y_ref_q, atol=1e-2, rtol=1e-2)
    assert jnp.allclose(y, y_ref_f, atol=5e-2, rtol=5e-2)

    # --- larger, non-divisible batch (grid > 1, small tail padding, parallel axis) ---
    big_batch = 300
    xb = jax.random.normal(kx2, (big_batch, input_size), jnp.float32)
    yb = bayesian_nn_forward(xb, w1t, b1r, w2t, b2r, block_batch=128)
    jax.block_until_ready(yb)
    assert yb.shape == (big_batch, output_size)
    assert jnp.allclose(yb, _ref_forward_quantized(xb, w1, b1, w2, b2),
                        atol=1e-2, rtol=1e-2)

    print("KERNEL_OK")
</pallas_src>

<mosaic_0001>
module attributes {stable_mosaic.version = 11 : i64} {
  func.func @bayesian_nn_kernel(%arg0: i32, %arg1: memref<8x32xf32, #tpu.memory_space<vmem>>, %arg2: memref<32x64xbf16, #tpu.memory_space<vmem>>, %arg3: memref<1x64xf32, #tpu.memory_space<vmem>>, %arg4: memref<64x16xbf16, #tpu.memory_space<vmem>>, %arg5: memref<1x16xf32, #tpu.memory_space<vmem>>, %arg6: memref<8x16xf32, #tpu.memory_space<vmem>>) attributes {dimension_semantics = [#tpu.dimension_semantics<parallel>], iteration_bounds = array<i64: 1>, scalar_prefetch = 0 : i64, scratch_operands = 0 : i64, tpu.core_type = #tpu.core_type<tc>, window_params = [{transform_indices = @transform_0, window_bounds = array<i64: 8, 32>}, {pipeline_mode = #tpu.pipeline_mode<synchronous>, transform_indices = @transform_1, window_bounds = array<i64: 32, 64>}, {pipeline_mode = #tpu.pipeline_mode<synchronous>, transform_indices = @transform_2, window_bounds = array<i64: 1, 64>}, {pipeline_mode = #tpu.pipeline_mode<synchronous>, transform_indices = @transform_3, window_bounds = array<i64: 64, 16>}, {pipeline_mode = #tpu.pipeline_mode<synchronous>, transform_indices = @transform_4, window_bounds = array<i64: 1, 16>}, {transform_indices = @transform_5, window_bounds = array<i64: 8, 16>}]} {
    %c0 = arith.constant 0 : index
    %c0_0 = arith.constant 0 : index
    %0 = vector.load %arg1[%c0, %c0_0] : memref<8x32xf32, #tpu.memory_space<vmem>>, vector<8x32xf32>
    %1 = arith.truncf %0 : vector<8x32xf32> to vector<8x32xbf16>
    %c0_1 = arith.constant 0 : index
    %c0_2 = arith.constant 0 : index
    %2 = vector.load %arg2[%c0_1, %c0_2] : memref<32x64xbf16, #tpu.memory_space<vmem>>, vector<32x64xbf16>
    %cst = arith.constant dense<0.000000e+00> : vector<8x64xf32>
    %3 = tpu.matmul %1, %2, %cst {dimension_numbers = #tpu.dot_dimension_numbers<[1], [0], [0], [1], [0, 0, 1, 1], [], []>} : vector<8x32xbf16>, vector<32x64xbf16>, vector<8x64xf32> -> vector<8x64xf32>
    %c0_3 = arith.constant 0 : index
    %c0_4 = arith.constant 0 : index
    %4 = vector.load %arg3[%c0_3, %c0_4] : memref<1x64xf32, #tpu.memory_space<vmem>>, vector<1x64xf32>
    %5 = vector.broadcast %4 : vector<1x64xf32> to vector<8x64xf32>
    %6 = arith.addf %3, %5 : vector<8x64xf32>
    %cst_5 = arith.constant 0.000000e+00 : f32
    %7 = vector.broadcast %cst_5 : f32 to vector<8x64xf32>
    %8 = arith.maximumf %6, %7 : vector<8x64xf32>
    %9 = arith.truncf %8 : vector<8x64xf32> to vector<8x64xbf16>
    %c0_6 = arith.constant 0 : index
    %c0_7 = arith.constant 0 : index
    %10 = vector.load %arg4[%c0_6, %c0_7] : memref<64x16xbf16, #tpu.memory_space<vmem>>, vector<64x16xbf16>
    %cst_8 = arith.constant dense<0.000000e+00> : vector<8x16xf32>
    %11 = tpu.matmul %9, %10, %cst_8 {dimension_numbers = #tpu.dot_dimension_numbers<[1], [0], [0], [1], [0, 0, 1, 1], [], []>} : vector<8x64xbf16>, vector<64x16xbf16>, vector<8x16xf32> -> vector<8x16xf32>
    %c0_9 = arith.constant 0 : index
    %c0_10 = arith.constant 0 : index
    %12 = vector.load %arg5[%c0_9, %c0_10] : memref<1x16xf32, #tpu.memory_space<vmem>>, vector<1x16xf32>
    %13 = vector.broadcast %12 : vector<1x16xf32> to vector<8x16xf32>
    %14 = arith.addf %11, %13 : vector<8x16xf32>
    %c0_11 = arith.constant 0 : index
    %c0_12 = arith.constant 0 : index
    %15 = vector.load %arg6[%c0_11, %c0_12] : memref<8x16xf32, #tpu.memory_space<vmem>>, vector<8x16xf32>
    tpu.vector_store %arg6[%c0_11, %c0_12], %14 {strides = array<i32>} : memref<8x16xf32, #tpu.memory_space<vmem>>, vector<8x16xf32>,
    return
  }
  func.func @transform_0(%arg0: i32) -> (i32, i32) {
    %c0_i32 = arith.constant 0 : i32
    %c0_i32_0 = arith.constant 0 : i32
    return %arg0, %c0_i32 : i32, i32
  }
  func.func @transform_1(%arg0: i32) -> (i32, i32) {
    %c0_i32 = arith.constant 0 : i32
    %c0_i32_0 = arith.constant 0 : i32
    %c0_i32_1 = arith.constant 0 : i32
    return %c0_i32, %c0_i32_0 : i32, i32
  }
  func.func @transform_2(%arg0: i32) -> (i32, i32) {
    %c0_i32 = arith.constant 0 : i32
    %c0_i32_0 = arith.constant 0 : i32
    %c0_i32_1 = arith.constant 0 : i32
    return %c0_i32, %c0_i32_0 : i32, i32
  }
  func.func @transform_3(%arg0: i32) -> (i32, i32) {
    %c0_i32 = arith.constant 0 : i32
    %c0_i32_0 = arith.constant 0 : i32
    %c0_i32_1 = arith.constant 0 : i32
    return %c0_i32, %c0_i32_0 : i32, i32
  }
  func.func @transform_4(%arg0: i32) -> (i32, i32) {
    %c0_i32 = arith.constant 0 : i32
    %c0_i32_0 = arith.constant 0 : i32
    %c0_i32_1 = arith.constant 0 : i32
    return %c0_i32, %c0_i32_0 : i32, i32
  }
  func.func @transform_5(%arg0: i32) -> (i32, i32) {
    %c0_i32 = arith.constant 0 : i32
    %c0_i32_0 = arith.constant 0 : i32
    return %arg0, %c0_i32 : i32, i32
  }
}

</mosaic_0001>

<bundles_post_ra>
// kernel: bayesian_nn_forward.1
= control target key start
LH: loop header
LB: loop body
LE: loop exit
PB: predicated region body
PF: predicated region fallthrough
CT: control target
= control target key end

     0   :  { %v261_v1 = vmov 0.0   ;;  %vm262_vm0 = vmmov 0   ;;  %vm47_vm1 = vcmask 261120   ;;  %s324_s0 = inlined_call_operand.vmem [shape: f32[8,32], index: 0, kind: input, shape index: {}]   ;;  %s325_s1 = inlined_call_operand.vmem [shape: bf16[32,64], index: 1, kind: input, shape index: {}]   ;;  %s326_s2 = inlined_call_operand.vmem [shape: f32[1,64], index: 2, kind: input, shape index: {}]   ;;  %s327_s3 = inlined_call_operand.vmem [shape: bf16[64,16], index: 3, kind: input, shape index: {}]   ;;  %s328_s4 = inlined_call_operand.vmem [shape: f32[1,16], index: 4, kind: input, shape index: {}]   ;;  %s329_s5 = inlined_call_operand.hbm [shape: f32[8,16], index: 5, kind: output, shape index: {}]  }
   0x1   :  { %v233_v0 = vld [vmem:[%s325_s1 + $0x8] sm:$0xff]   ;;  %210 = vmatprep.subr.bf16.mxu0 %v261_v1  ;;  %v234_v2 = vld [vmem:[%s325_s1] sm:$0xff]   ;;  %218 = vmatprep.subr.bf16.mxu1 %v261_v1  ;;  %v235_v4 = vld [vmem:[%s327_s3 + $0x18] sm:$0xff]  }
   0x2   :  { %211 = vmatpush3.bf16.msra.mxu0 %v233_v0  ;;  %214 = vmatprep.mubr.msk.bf16.mxu0 %vm262_vm0, %v261_v1  ;;  %v22_v3 = vld [vmem:[%s324_s0] sm:$0xff]  ;;  %v236_v5 = vld [vmem:[%s327_s3 + $0x10] sm:$0xff]  }
   0x3   :  { %212 = vmatprep.subr.bf16.mxu0 %v261_v1  ;;  %226 = vmatprep.mubr.msk.bf16.mxu1 %vm262_vm0, %v261_v1  ;;  %v23_v6 = vpack.c.bf16 %v22_v3, %v22_v3 }
   0x4   :  { %219 = vmatpush3.bf16.msra.mxu1 %v235_v4 }
   0x5   :  { %220 = vmatprep.subr.bf16.mxu1 %v261_v1 }
   0x6   :  { %213 = vmatpush3.bf16.msra.mxu0 %v234_v2 }
   0x7   :  { %10 = vsyncpa [#allocation3], 0  ;;  %v237_v7 = vld [vmem:[%s327_s3 + $0x8] sm:$0xff]   ;;  %v238_v8 = vld [vmem:[%s327_s3] sm:$0xff]   ;;  %vm132_vm2 = vcmask 523264   ;;  %s263_s9 = smov [#allocation2]  }
   0x8   :  { %221 = vmatpush3.bf16.msra.mxu1 %v236_v5  ;;  %v192_v9 = vld [vmem:[%s326_s2] ss:$0 sm:$0xff]  ;;  %s184_s3 = sshll.u32 %s263_s9, 4  ;;  %vm176_vm3 = vcmask 130048   ;;  %s185_s3 = int_to_ptr.vmem [resolvable:$true] %s184_s3 }
   0x9   :  { %215 = vmatmul.mubr.msk.bf16.vlgmr.msra.gmra.mxu0 %vm47_vm1, %v23_v6  ;;  %222 = vmatprep.subr.bf16.mxu1 %v261_v1  ;;  %v196_v17 = vld [vmem:[%s328_s4] ss:$0 sm:$0xff]  ;;  %s239_s2 = scalar_lea.vmem %s185_s3, 128  ;;  %p244_p1 = scmp.lt.s32.totalorder %s185_s3, %s185_s3 }
   0xa   :  { %p240_p0 = scmp.ne.s32.totalorder %s185_s3, %s239_s2  ;;  %p245_p2 = scmp.lt.s32.totalorder %s239_s2, %s239_s2 }
   0xc   :  { %223 = vmatpush3.bf16.msra.mxu1 %v237_v7  ;;  %p246_p3 = por %p245_p2, %p244_p1 }
   0xd   :  { %224 = vmatprep.subr.bf16.mxu1 %v261_v1 }
   0xe   :  { %p247_p4 = pnand %p246_p3, %p240_p0 }
  0x10   :  { %225 = vmatpush3.bf16.msra.mxu1 %v238_v8 }
  0xc9   :  { %v85_v10 = vpop.f32.mrf.mxu0 }
  0xca   :  { %v86_v11 = vadd.f32 %v192_v9, %v85_v10 }
  0xcb   :  { %v216_v12 = vpop.f32.mrf.mxu0 }
  0xcc   :  { %v91_v13 = vmax.f32 %v86_v11, 0.0 }
  0xcd   :  { %v88_v14 = vpop.f32.mrf.mxu0 }
  0xce   :  { %v92_v15 = vpack.c.bf16 %v91_v13, %v91_v13 }
  0xcf   :  { %v217_v16 = vpop.f32.mrf.mxu0 }
  0xd0   :  { %227 = vmatmul.mubr.msk.bf16.vlgmr.msra.gmra.mxu1 %vm132_vm2, %v92_v15 }
 0x190   :  { %v170_v18 = vpop.f32.mrf.mxu1 }
 0x191   :  { %v171_v19 = vadd.f32 %v196_v17, %v170_v18 }
 0x192   :  { %v228_v20 = vpop.f32.mrf.mxu1 }
 0x193   :  { %177 = vst.msk [vmem:[#allocation2] sm:$0xff] %vm176_vm3, %v171_v19 }
 0x194   :  { %v173_v21 = vpop.f32.mrf.mxu1 }
 0x195   :  { %250 = shalt.err (!%p247_p4)
}
 0x196   :  { %187 = dma.vmem_to_hbm [thread:$0]  %s185_s3, 128, %s329_s5, [#allocation3]   ;;  %v229_v22 = vpop.f32.mrf.mxu1 }
 0x197   :  { %259 = dma.done.wait [#allocation3], 128  }
 0x198   :  { %260 = vsyncadd [#allocation3], 4294967168 }
 0x199   :  { %191 = vsyncpa [#allocation3], 1 }

</bundles_post_ra>
